<compile_context>
chip_gen: v6e
topology: v6e:2x2x1
jax: 0.10.0
libtpu: 0.0.40
codegen_flags: <defaults>
</compile_context>

<pallas_src>
import functools

import jax
import jax.numpy as jnp
from jax import lax
from jax.experimental import pallas as pl
from jax.experimental.pallas import tpu as pltpu


def _argmax_kernel(logits_ref, out_ref, max_sc, idx_sc, *, vocab_size):
    """Streaming argmax over the vocab axis.

    Grid = (batch_blocks, vocab_blocks); vocab is the innermost (reduction) axis.
    logits_ref block: (BB, TV) in VMEM.  Running (max, argmax) live in VMEM scratch
    across vocab steps; the (BB, 1) int32 output is written only on the last step.
    """
    vstep = pl.program_id(1)
    BB, TV = logits_ref.shape

    @pl.when(vstep == 0)
    def _():
        max_sc[...] = jnp.full_like(max_sc, -jnp.inf)
        idx_sc[...] = jnp.zeros_like(idx_sc)

    x = logits_ref[...].astype(jnp.float32)                           # (BB, TV)

    # Global column index of every lane in this tile; mask out-of-vocab lanes
    # (stale VMEM in a ragged trailing tile) so they can never win the max.
    col = lax.broadcasted_iota(jnp.int32, (BB, TV), 1) + vstep * TV
    x = jnp.where(col < vocab_size, x, -jnp.inf)

    blk_max = jnp.max(x, axis=-1, keepdims=True)                      # (BB, 1)
    cand = jnp.where(x == blk_max, col, jnp.int32(2**31 - 1))
    blk_idx = jnp.min(cand, axis=-1, keepdims=True)                   # first max in tile

    # Strict '>' keeps the earliest (lowest-index) occurrence of the global max,
    # matching jnp.argmax / torch.argmax first-occurrence semantics.
    better = blk_max > max_sc[...]
    idx_sc[...] = jnp.where(better, blk_idx, idx_sc[...])
    max_sc[...] = jnp.where(better, blk_max, max_sc[...])

    @pl.when(vstep == pl.num_programs(1) - 1)
    def _():
        out_ref[...] = idx_sc[...]


def sampler_forward(logits, temperature: float = 1.0, top_p: float = 0.4, top_k: int = 10):
    """Pallas equivalent of Sampler.forward; returns [B, 1] int32 token ids.

    temperature / top_p / top_k are accepted for API parity but cannot change the
    returned argmax (the top-1 token is never truncated and argmax is invariant
    under temperature scaling and softmax), so they are not used in the kernel.
    """
    del temperature, top_p, top_k  # argmax-invariant; see module docstring.

    B, V = logits.shape

    # Batch tile: full-sublane rows; a block equal to the full (small) batch is exact.
    BB = B if B <= 8 else 8
    # Vocab tile: lane-dense, large enough to amortize per-step overhead (~1 MiB/block,
    # double-buffered by the pipeline).  If the whole row fits, use one exact block.
    TV_MAX = 32768
    TV = V if V <= TV_MAX else TV_MAX

    grid = (pl.cdiv(B, BB), pl.cdiv(V, TV))

    out = pl.pallas_call(
        functools.partial(_argmax_kernel, vocab_size=V),
        out_shape=jax.ShapeDtypeStruct((B, 1), jnp.int32),
        grid_spec=pltpu.PrefetchScalarGridSpec(
            num_scalar_prefetch=0,
            grid=grid,
            in_specs=[pl.BlockSpec((BB, TV), lambda b, v: (b, v))],
            out_specs=pl.BlockSpec((BB, 1), lambda b, v: (b, 0)),
            scratch_shapes=[
                pltpu.VMEM((BB, 1), jnp.float32),   # running max
                pltpu.VMEM((BB, 1), jnp.int32),     # running argmax
            ],
        ),
        compiler_params=pltpu.CompilerParams(
            dimension_semantics=("parallel", "arbitrary")
        ),
    )(logits)
    return out


def _reference_forward(logits, temperature=1.0, top_p=0.4, top_k=10):
    """Plain-JAX reference mirroring the torch code (sort / cumsum based)."""
    x = logits.astype(jnp.float32)
    if temperature != 1.0:
        x = x / temperature
    order = jnp.argsort(-x, axis=-1)                       # descending sort
    x_sort = jnp.take_along_axis(x, order, axis=-1)
    p_sort = jax.nn.softmax(x_sort, axis=-1)
    excl = jnp.cumsum(p_sort, axis=-1) - p_sort
    masked = x_sort
    if top_p < 1.0:
        masked = jnp.where(excl > top_p, -jnp.inf, masked)
    if top_k > 0:
        pos = jnp.arange(x.shape[-1])[None, :]
        masked = jnp.where(pos >= top_k, -jnp.inf, masked)
    inv = jnp.argsort(order, axis=-1)
    unsorted = jnp.take_along_axis(masked, inv, axis=-1)
    return jnp.argmax(unsorted, axis=-1)[:, None].astype(jnp.int32)


if __name__ == "__main__":
    # Small but non-trivial shapes: batch not a multiple of 8 and vocab not a multiple
    # of 128 (exercises the exact full-dim block path); the tiled streaming path is the
    # same kernel with more grid steps.
    B, V = 6, 5000
    key = jax.random.PRNGKey(0)
    logits = jax.random.normal(key, (B, V), dtype=jnp.float32) * 3.0

    pred = sampler_forward(logits, temperature=0.7, top_p=0.4, top_k=10)
    pred = jax.block_until_ready(pred)

    ref = _reference_forward(logits, temperature=0.7, top_p=0.4, top_k=10)
    assert pred.shape == (B, 1) and pred.dtype == jnp.int32, (pred.shape, pred.dtype)
    assert jnp.array_equal(pred, ref), (pred, ref)
    print("KERNEL_OK")
</pallas_src>

<mosaic_0001>
module attributes {stable_mosaic.version = 11 : i64} {
  func.func @_argmax_kernel(%arg0: i32, %arg1: i32, %arg2: memref<6x5000xf32, #tpu.memory_space<vmem>>, %arg3: memref<6x1xi32, #tpu.memory_space<vmem>>, %arg4: memref<6x1xf32, #tpu.memory_space<vmem>>, %arg5: memref<6x1xi32, #tpu.memory_space<vmem>>) attributes {dimension_semantics = [#tpu.dimension_semantics<parallel>, #tpu.dimension_semantics<arbitrary>], iteration_bounds = array<i64: 1, 1>, scalar_prefetch = 0 : i64, scratch_operands = 2 : i64, tpu.core_type = #tpu.core_type<tc>, window_params = [{transform_indices = @transform_0, window_bounds = array<i64: 6, 5000>}, {transform_indices = @transform_1, window_bounds = array<i64: 6, 1>}]} {
    %c0_i32 = arith.constant 0 : i32
    %0 = arith.cmpi eq, %arg1, %c0_i32 : i32
    %1 = arith.extui %0 : i1 to i32
    %c0_i32_0 = arith.constant 0 : i32
    %2 = arith.cmpi ne, %1, %c0_i32_0 : i32
    scf.if %2 {
      %cst_17 = arith.constant 0xFF800000 : f32
      %31 = vector.broadcast %cst_17 : f32 to vector<6x1xf32>
      %c0_18 = arith.constant 0 : index
      %c0_19 = arith.constant 0 : index
      %32 = vector.load %arg4[%c0_18, %c0_19] : memref<6x1xf32, #tpu.memory_space<vmem>>, vector<6x1xf32>
      tpu.vector_store %arg4[%c0_18, %c0_19], %31 {strides = array<i32>} : memref<6x1xf32, #tpu.memory_space<vmem>>, vector<6x1xf32>,
      %c0_i32_20 = arith.constant 0 : i32
      %33 = vector.broadcast %c0_i32_20 : i32 to vector<6x1xi32>
      %c0_21 = arith.constant 0 : index
      %c0_22 = arith.constant 0 : index
      %34 = vector.load %arg5[%c0_21, %c0_22] : memref<6x1xi32, #tpu.memory_space<vmem>>, vector<6x1xi32>
      tpu.vector_store %arg5[%c0_21, %c0_22], %33 {strides = array<i32>} : memref<6x1xi32, #tpu.memory_space<vmem>>, vector<6x1xi32>,
    } else {
    }
    %c0 = arith.constant 0 : index
    %c0_1 = arith.constant 0 : index
    %3 = vector.load %arg2[%c0, %c0_1] : memref<6x5000xf32, #tpu.memory_space<vmem>>, vector<6x5000xf32>
    %4 = tpu.iota {dimensions = array<i32: 1>} : vector<6x5000xi32>
    %c5000_i32 = arith.constant 5000 : i32
    %5 = arith.muli %arg1, %c5000_i32 : i32
    %6 = vector.broadcast %5 : i32 to vector<6x5000xi32>
    %7 = arith.addi %4, %6 : vector<6x5000xi32>
    %c5000_i32_2 = arith.constant 5000 : i32
    %8 = vector.broadcast %c5000_i32_2 : i32 to vector<6x5000xi32>
    %9 = arith.cmpi slt, %7, %8 : vector<6x5000xi32>
    %cst = arith.constant 0xFF800000 : f32
    %10 = vector.broadcast %cst : f32 to vector<6x5000xf32>
    %11 = arith.select %9, %3, %10 : vector<6x5000xi1>, vector<6x5000xf32>
    %cst_3 = arith.constant dense<0xFF800000> : vector<6xf32>
    %12 = vector.multi_reduction <maximumf>, %11, %cst_3 [1] : vector<6x5000xf32> to vector<6xf32>
    %13 = vector.shape_cast %12 : vector<6xf32> to vector<6x1xf32>
    %14 = vector.broadcast %13 : vector<6x1xf32> to vector<6x5000xf32>
    %15 = arith.cmpf oeq, %11, %14 : vector<6x5000xf32>
    %c2147483647_i32 = arith.constant 2147483647 : i32
    %16 = vector.broadcast %c2147483647_i32 : i32 to vector<6x5000xi32>
    %17 = arith.select %15, %7, %16 : vector<6x5000xi1>, vector<6x5000xi32>
    %cst_4 = arith.constant dense<2147483647> : vector<6xi32>
    %18 = vector.multi_reduction <minsi>, %17, %cst_4 [1] : vector<6x5000xi32> to vector<6xi32>
    %19 = vector.shape_cast %18 : vector<6xi32> to vector<6x1xi32>
    %c0_5 = arith.constant 0 : index
    %c0_6 = arith.constant 0 : index
    %20 = vector.load %arg4[%c0_5, %c0_6] : memref<6x1xf32, #tpu.memory_space<vmem>>, vector<6x1xf32>
    %21 = arith.cmpf ogt, %13, %20 : vector<6x1xf32>
    %c0_7 = arith.constant 0 : index
    %c0_8 = arith.constant 0 : index
    %22 = vector.load %arg5[%c0_7, %c0_8] : memref<6x1xi32, #tpu.memory_space<vmem>>, vector<6x1xi32>
    %23 = arith.select %21, %19, %22 : vector<6x1xi1>, vector<6x1xi32>
    %c0_9 = arith.constant 0 : index
    %c0_10 = arith.constant 0 : index
    %24 = vector.load %arg5[%c0_9, %c0_10] : memref<6x1xi32, #tpu.memory_space<vmem>>, vector<6x1xi32>
    tpu.vector_store %arg5[%c0_9, %c0_10], %23 {strides = array<i32>} : memref<6x1xi32, #tpu.memory_space<vmem>>, vector<6x1xi32>,
    %c0_11 = arith.constant 0 : index
    %c0_12 = arith.constant 0 : index
    %25 = vector.load %arg4[%c0_11, %c0_12] : memref<6x1xf32, #tpu.memory_space<vmem>>, vector<6x1xf32>
    %26 = arith.select %21, %13, %25 : vector<6x1xi1>, vector<6x1xf32>
    %c0_13 = arith.constant 0 : index
    %c0_14 = arith.constant 0 : index
    %27 = vector.load %arg4[%c0_13, %c0_14] : memref<6x1xf32, #tpu.memory_space<vmem>>, vector<6x1xf32>
    tpu.vector_store %arg4[%c0_13, %c0_14], %26 {strides = array<i32>} : memref<6x1xf32, #tpu.memory_space<vmem>>, vector<6x1xf32>,
    %c0_i32_15 = arith.constant 0 : i32
    %28 = arith.cmpi eq, %arg1, %c0_i32_15 : i32
    %29 = arith.extui %28 : i1 to i32
    %c0_i32_16 = arith.constant 0 : i32
    %30 = arith.cmpi ne, %29, %c0_i32_16 : i32
    scf.if %30 {
      %c0_17 = arith.constant 0 : index
      %c0_18 = arith.constant 0 : index
      %31 = vector.load %arg5[%c0_17, %c0_18] : memref<6x1xi32, #tpu.memory_space<vmem>>, vector<6x1xi32>
      %c0_19 = arith.constant 0 : index
      %c0_20 = arith.constant 0 : index
      %32 = vector.load %arg3[%c0_19, %c0_20] : memref<6x1xi32, #tpu.memory_space<vmem>>, vector<6x1xi32>
      tpu.vector_store %arg3[%c0_19, %c0_20], %31 {strides = array<i32>} : memref<6x1xi32, #tpu.memory_space<vmem>>, vector<6x1xi32>,
    } else {
    }
    return
  }
  func.func @transform_0(%arg0: i32, %arg1: i32) -> (i32, i32) {
    %c0_i32 = arith.constant 0 : i32
    return %arg0, %arg1 : i32, i32
  }
  func.func @transform_1(%arg0: i32, %arg1: i32) -> (i32, i32) {
    %c0_i32 = arith.constant 0 : i32
    %c0_i32_0 = arith.constant 0 : i32
    return %arg0, %c0_i32 : i32, i32
  }
}

</mosaic_0001>

<bundles_post_ra>
// kernel: tpu_custom_call.1
= control target key start
LH: loop header
LB: loop body
LE: loop exit
PB: predicated region body
PF: predicated region fallthrough
CT: control target
= control target key end

     0   :  { %6 = vsyncpa [#allocation5], 0  ;;  %s569_s6 = smov [#allocation4]   ;;  %s1243_s0 = inlined_call_operand.hbm [shape: f32[6,5000], index: 0, kind: input, shape index: {}]   ;;  %s1244_s1 = inlined_call_operand.vmem [shape: s32[6,1], index: 1, kind: output, shape index: {}]  }
   0x1   :  { %s13_s7 = sshll.u32 %s569_s6, 4  ;;  %s14_s7 = int_to_ptr.vmem [resolvable:$true] %s13_s7 }
   0x2   :  { %s555_s8 = scalar_lea.vmem %s14_s7, 5120  ;;  %p560_p1 = scmp.lt.s32.totalorder %s14_s7, %s14_s7 }
   0x3   :  { %p556_p0 = scmp.ne.s32.totalorder %s14_s7, %s555_s8  ;;  %p561_p2 = scmp.lt.s32.totalorder %s555_s8, %s555_s8 }
   0x5   :  { %p562_p3 = por %p561_p2, %p560_p1 }
   0x7   :  { %p563_p4 = pnand %p562_p3, %p556_p0 }
   0x9   :  { %566 = shalt.err (!%p563_p4)
}
   0xa   :  { %16 = dma.hbm_to_vmem [thread:$0]  %s1243_s0, 5120, %s14_s7, [#allocation5]  }
   0xb   :  { %567 = dma.done.wait [#allocation5], 5120  }
   0xc   :  { %568 = vsyncadd [#allocation5], 4294962176  ;;  %v67_v0 = vlaneseq  ;;  %vm1253_vm1 = vcmask 1045504   ;;  %v591_v3 = vld [vmem:[#allocation4] sm:$0x3f]  ;;  %vm1252_vm2 = vcmask 62464  }
   0xd   :  { %v593_v4 = vld [vmem:[#allocation4 + $0x8] sm:$0x3f]  ;;  %v595_v5 = vld [vmem:[#allocation4 + $0x10] sm:$0x3f]  ;;  %v597_v6 = vld [vmem:[#allocation4 + $0x18] sm:$0x3f] }
   0xe   :  { %v585_v1 = vand.u32 127, %v67_v0  ;;  %v599_v7 = vld [vmem:[#allocation4 + $0x20] sm:$0x3f]  ;;  %v601_v8 = vld [vmem:[#allocation4 + $0x28] sm:$0x3f]  ;;  %v231_v19 = vsel %vm1253_vm1, %v591_v3, -inf }
   0xf   :  { %v603_v9 = vld [vmem:[#allocation4 + $0x30] sm:$0x3f]  ;;  %v605_v10 = vld [vmem:[#allocation4 + $0x38] sm:$0x3f]  ;;  %v607_v11 = vld [vmem:[#allocation4 + $0x40] sm:$0x3f] }
  0x10   :  { %v588_v2 = vadd.s32 4992, %v585_v1  ;;  %v609_v12 = vld [vmem:[#allocation4 + $0x48] sm:$0x3f]  ;;  %v611_v13 = vld [vmem:[#allocation4 + $0x50] sm:$0x3f]  ;;  %v232_v20 = vsel %vm1253_vm1, %v593_v4, -inf }
  0x11   :  { %v613_v14 = vld [vmem:[#allocation4 + $0x58] sm:$0x3f]  ;;  %v615_v15 = vld [vmem:[#allocation4 + $0x60] sm:$0x3f]  ;;  %v617_v16 = vld [vmem:[#allocation4 + $0x68] sm:$0x3f] }
  0x12   :  { %1256 = vst [vmem:[#allocation7_spill] sm:$0xff] %v588_v2  ;;  %vm189_vm0 = vcmp.lt.s32.totalorder %v588_v2, 5000  ;;  %v619_v17 = vld [vmem:[#allocation4 + $0x70] sm:$0x3f]  ;;  %v66_v18 = vld [vmem:[#allocation4 + $0x138] sm:$0x3f] }
  0x13   :  { %v233_v21 = vsel %vm1253_vm1, %v595_v5, -inf  ;;  %v234_v22 = vsel %vm1253_vm1, %v597_v6, -inf  ;;  %v629_v23 = vld [vmem:[#allocation4 + $0x78] sm:$0x3f]  ;;  %v633_v24 = vsel %vm189_vm0, %v66_v18, -inf  ;;  %v235_v25 = vsel %vm1253_vm1, %v599_v7, -inf }
  0x14   :  { %1257 = vst [vmem:[#allocation8_spill] sm:$0xff] %v633_v24  ;;  %v237_v26 = vsel %vm1253_vm1, %v601_v8, -inf  ;;  %v239_v27 = vsel %vm1253_vm1, %v603_v9, -inf  ;;  %v641_v28 = vld [vmem:[#allocation4 + $0x80] sm:$0x3f]  ;;  %v236_v31 = vmax.f32 %v231_v19, %v235_v25  ;;  %v241_v34 = vsel %vm1253_vm1, %v605_v10, -inf }
  0x15   :  { %v643_v29 = vld [vmem:[#allocation4 + $0x88] sm:$0x3f]  ;;  %v645_v30 = vld [vmem:[#allocation4 + $0x90] sm:$0x3f]  ;;  %v238_v32 = vmax.f32 %v232_v20, %v237_v26  ;;  %v240_v33 = vmax.f32 %v233_v21, %v239_v27  ;;  %v649_v35 = vld [vmem:[#allocation4 + $0x98] sm:$0x3f]  ;;  %v242_v36 = vmax.f32 %v234_v22, %v241_v34 }
  0x16   :  { %v243_v37 = vsel %vm1253_vm1, %v607_v11, -inf  ;;  %v245_v38 = vsel %vm1253_vm1, %v609_v12, -inf  ;;  %v247_v39 = vsel %vm1253_vm1, %v611_v13, -inf  ;;  %v657_v40 = vld [vmem:[#allocation4 + $0xa0] sm:$0x3f]  ;;  %v249_v46 = vsel %vm1253_vm1, %v613_v14, -inf }
  0x17   :  { %v659_v41 = vld [vmem:[#allocation4 + $0xa8] sm:$0x3f]  ;;  %v661_v42 = vld [vmem:[#allocation4 + $0xb0] sm:$0x3f]  ;;  %v244_v43 = vmax.f32 %v236_v31, %v243_v37  ;;  %v246_v44 = vmax.f32 %v238_v32, %v245_v38  ;;  %v248_v45 = vmax.f32 %v240_v33, %v247_v39  ;;  %v665_v47 = vld [vmem:[#allocation4 + $0xb8] sm:$0x3f]  ;;  %v250_v48 = vmax.f32 %v242_v36, %v249_v46 }
  0x18   :  { %v251_v49 = vsel %vm1253_vm1, %v615_v15, -inf  ;;  %v253_v50 = vsel %vm1253_vm1, %v617_v16, -inf  ;;  %v255_v51 = vsel %vm1253_vm1, %v619_v17, -inf  ;;  %v673_v52 = vld [vmem:[#allocation4 + $0xc0] sm:$0x3f]  ;;  %v257_v58 = vsel %vm1253_vm1, %v629_v23, -inf }
  0x19   :  { %v675_v53 = vld [vmem:[#allocation4 + $0xc8] sm:$0x3f]  ;;  %v677_v54 = vld [vmem:[#allocation4 + $0xd0] sm:$0x3f]  ;;  %v252_v55 = vmax.f32 %v244_v43, %v251_v49  ;;  %v254_v56 = vmax.f32 %v246_v44, %v253_v50  ;;  %v256_v57 = vmax.f32 %v248_v45, %v255_v51  ;;  %v681_v59 = vld [vmem:[#allocation4 + $0xd8] sm:$0x3f]  ;;  %v258_v60 = vmax.f32 %v250_v48, %v257_v58 }
  0x1a   :  { %v259_v61 = vsel %vm1253_vm1, %v641_v28, -inf  ;;  %v261_v62 = vsel %vm1253_vm1, %v643_v29, -inf  ;;  %v263_v63 = vsel %vm1253_vm1, %v645_v30, -inf  ;;  %v689_v0 = vld [vmem:[#allocation4 + $0xe0] sm:$0x3f]  ;;  %v265_v22 = vsel %vm1253_vm1, %v649_v35, -inf }
  0x1b   :  { %v691_v18 = vld [vmem:[#allocation4 + $0xe8] sm:$0x3f]  ;;  %v260_v19 = vmax.f32 %v252_v55, %v259_v61  ;;  %v262_v20 = vmax.f32 %v254_v56, %v261_v62  ;;  %v264_v21 = vmax.f32 %v256_v57, %v263_v63  ;;  %v695_v25 = vld [vmem:[#allocation4 + $0xf0] sm:$0x3f]  ;;  %v266_v26 = vmax.f32 %v258_v60, %v265_v22  ;;  %v703_v33 = vld [vmem:[#allocation4 + $0xf8] sm:$0x3f] }
  0x1c   :  { %v267_v27 = vsel %vm1253_vm1, %v657_v40, -inf  ;;  %v269_v31 = vsel %vm1253_vm1, %v659_v41, -inf  ;;  %v271_v32 = vsel %vm1253_vm1, %v661_v42, -inf  ;;  %v705_v34 = vld [vmem:[#allocation4 + $0x100] sm:$0x3f]  ;;  %v273_v39 = vsel %vm1253_vm1, %v665_v47, -inf }
  0x1d   :  { %v268_v36 = vmax.f32 %v260_v19, %v267_v27  ;;  %v270_v37 = vmax.f32 %v262_v20, %v269_v31  ;;  %v272_v38 = vmax.f32 %v264_v21, %v271_v32  ;;  %v709_v43 = vld [vmem:[#allocation4 + $0x108] sm:$0x3f]  ;;  %v274_v44 = vmax.f32 %v266_v26, %v273_v39  ;;  %v717_v49 = vld [vmem:[#allocation4 + $0x110] sm:$0x3f]  ;;  %v719_v50 = vld [vmem:[#allocation4 + $0x118] sm:$0x3f] }
  0x1e   :  { %v275_v45 = vsel %vm1253_vm1, %v673_v52, -inf  ;;  %v277_v46 = vsel %vm1253_vm1, %v675_v53, -inf  ;;  %v279_v48 = vsel %vm1253_vm1, %v677_v54, -inf  ;;  %v281_v57 = vsel %vm1253_vm1, %v681_v59, -inf  ;;  %v723_v58 = vld [vmem:[#allocation4 + $0x120] sm:$0x3f] }
  0x1f   :  { %v276_v51 = vmax.f32 %v268_v36, %v275_v45  ;;  %v278_v55 = vmax.f32 %v270_v37, %v277_v46  ;;  %v280_v56 = vmax.f32 %v272_v38, %v279_v48  ;;  %1258 = vst [vmem:[#allocation9_spill] sm:$0xff] %v723_v58  ;;  %v282_v60 = vmax.f32 %v274_v44, %v281_v57  ;;  %v731_v19 = vld [vmem:[#allocation4 + $0x128] sm:$0x3f]  ;;  %v733_v20 = vld [vmem:[#allocation4 + $0x130] sm:$0x3f] }
  0x20   :  { %v283_v61 = vsel %vm1253_vm1, %v689_v0, -inf  ;;  %v285_v62 = vsel %vm1253_vm1, %v691_v18, -inf  ;;  %v287_v63 = vsel %vm1253_vm1, %v695_v25, -inf  ;;  %1259 = vst [vmem:[#allocation10_spill] sm:$0xff] %v731_v19  ;;  %1260 = vst [vmem:[#allocation11_spill] sm:$0xff] %v733_v20  ;;  %v289_v27 = vsel %vm1253_vm1, %v703_v33, -inf }
  0x21   :  { %v284_v21 = vmax.f32 %v276_v51, %v283_v61  ;;  %v286_v22 = vmax.f32 %v278_v55, %v285_v62  ;;  %v288_v26 = vmax.f32 %v280_v56, %v287_v63  ;;  %v290_v31 = vmax.f32 %v282_v60, %v289_v27 }
  0x22   :  { %v291_v32 = vsel %vm1253_vm1, %v705_v34, -inf  ;;  %v293_v36 = vsel %vm1253_vm1, %v709_v43, -inf  ;;  %v295_v37 = vsel %vm1253_vm1, %v717_v49, -inf  ;;  %v297_v45 = vsel %vm1253_vm1, %v719_v50, -inf }
  0x23   :  { %v292_v38 = vmax.f32 %v284_v21, %v291_v32  ;;  %v294_v39 = vmax.f32 %v286_v22, %v293_v36  ;;  %v296_v44 = vmax.f32 %v288_v26, %v295_v37  ;;  %v298_v46 = vmax.f32 %v290_v31, %v297_v45 }
  0x24   :  { %v299_v48 = vsel %vm1253_vm1, %v723_v58, -inf  ;;  %v301_v51 = vsel %vm1253_vm1, %v731_v19, -inf  ;;  %v303_v55 = vsel %vm1253_vm1, %v733_v20, -inf  ;;  %v306_v61 = vsel %vm1252_vm2, %v633_v24, -inf }
  0x25   :  { %v300_v56 = vmax.f32 %v292_v38, %v299_v48  ;;  %v302_v57 = vmax.f32 %v294_v39, %v301_v51  ;;  %v304_v60 = vmax.f32 %v296_v44, %v303_v55  ;;  %v307_v62 = vmax.f32 %v298_v46, %v306_v61 }
  0x26   :  { %vm1254_vm3 = vcmask 5120   ;;  %v570_v26 = vmov -inf   ;;  %v755_v27 = vadd.s32 128, %v585_v1  ;;  %v758_v31 = vadd.s32 256, %v585_v1 }
  0x27   :  { %v308_v63 = vmax.f32 %v300_v56, %v302_v57  ;;  %v309_v21 = vmax.f32 %v304_v60, %v307_v62  ;;  %25 = vst.msk [vmem:[#allocation2] sm:$0x3f] %vm1254_vm3, %v570_v26  ;;  %v761_v32 = vadd.s32 384, %v585_v1  ;;  %v764_v36 = vadd.s32 512, %v585_v1 }
  0x28   :  { %v767_v37 = vadd.s32 640, %v585_v1  ;;  %v770_v38 = vadd.s32 768, %v585_v1  ;;  %v773_v39 = vadd.s32 896, %v585_v1  ;;  %v776_v44 = vadd.s32 1024, %v585_v1 }
  0x29   :  { %v310_v22 = vmax.f32 %v308_v63, %v309_v21  ;;  %v779_v45 = vadd.s32 1152, %v585_v1  ;;  %v782_v46 = vadd.s32 1280, %v585_v1  ;;  %v785_v48 = vadd.s32 1408, %v585_v1 }
  0x2a   :  { %v788_v51 = vadd.s32 1536, %v585_v1  ;;  %v791_v55 = vadd.s32 1664, %v585_v1  ;;  %v794_v56 = vadd.s32 1792, %v585_v1  ;;  %v797_v57 = vadd.s32 1920, %v585_v1 }
  0x2b   :  { %311 = vmax.xlane.f32.xlu0 %v310_v22  ;;  %v800_v60 = vadd.s32 2048, %v585_v1  ;;  %v803_v61 = vadd.s32 2176, %v585_v1  ;;  %v806_v62 = vadd.s32 2304, %v585_v1  ;;  %v809_v63 = vadd.s32 2432, %v585_v1 }
  0x2c   :  { %v812_v21 = vadd.s32 2560, %v585_v1  ;;  %v815_v22 = vadd.s32 2688, %v585_v1  ;;  %v818_v26 = vadd.s32 2816, %v585_v1  ;;  %v821_v2 = vadd.s32 2944, %v585_v1 }
  0x2d   :  { %v824_v24 = vadd.s32 3072, %v585_v1  ;;  %v827_v20 = vadd.s32 3200, %v585_v1  ;;  %v832_v58 = vadd.s32 3328, %v585_v1 }
  0x2e   :  { %1261 = vst [vmem:[#allocation12_spill] sm:$0xff] %v812_v21  ;;  %1262 = vst [vmem:[#allocation13_spill] sm:$0xff] %v815_v22  ;;  %v835_v21 = vadd.s32 3456, %v585_v1  ;;  %v838_v22 = vadd.s32 3584, %v585_v1 }
  0x2f   :  { %1263 = vst [vmem:[#allocation14_spill] sm:$0xff] %v818_v26  ;;  %1264 = vst [vmem:[#allocation15_spill] sm:$0xff] %v821_v2  ;;  %v841_v26 = vadd.s32 3712, %v585_v1  ;;  %v844_v2 = vadd.s32 3840, %v585_v1 }
  0x30   :  { %1265 = vst [vmem:[#allocation16_spill] sm:$0xff] %v824_v24  ;;  %1266 = vst [vmem:[#allocation17_spill] sm:$0xff] %v827_v20  ;;  %v847_v24 = vadd.s32 3968, %v585_v1  ;;  %v850_v20 = vadd.s32 4096, %v585_v1 }
  0x31   :  { %1267 = vst [vmem:[#allocation18_spill] sm:$0xff] %v832_v58  ;;  %1268 = vst [vmem:[#allocation19_spill] sm:$0xff] %v835_v21  ;;  %v853_v58 = vadd.s32 4224, %v585_v1  ;;  %v856_v21 = vadd.s32 4352, %v585_v1 }
  0x32   :  { %1269 = vst [vmem:[#allocation20_spill] sm:$0xff] %v838_v22  ;;  %1270 = vst [vmem:[#allocation21_spill] sm:$0xff] %v841_v26  ;;  %v859_v22 = vadd.s32 4480, %v585_v1  ;;  %v862_v26 = vadd.s32 4608, %v585_v1 }
  0x33   :  { %1271 = vst [vmem:[#allocation22_spill] sm:$0xff] %v844_v2  ;;  %1272 = vst [vmem:[#allocation23_spill] sm:$0xff] %v847_v24  ;;  %v865_v2 = vadd.s32 4736, %v585_v1  ;;  %v868_v24 = vadd.s32 4864, %v585_v1 }
  0x34   :  { %1273 = vst [vmem:[#allocation24_spill] sm:$0xff] %v853_v58  ;;  %1274 = vst [vmem:[#allocation25_spill] sm:$0xff] %v856_v21 }
  0x35   :  { %1275 = vst [vmem:[#allocation26_spill] sm:$0xff] %v859_v22  ;;  %1276 = vst [vmem:[#allocation27_spill] sm:$0xff] %v862_v26 }
  0x36   :  { %1277 = vst [vmem:[#allocation28_spill] sm:$0xff] %v865_v2  ;;  %1278 = vst [vmem:[#allocation29_spill] sm:$0xff] %v868_v24  ;;  %v916_v24 = vld [vmem:[#allocation2] sm:$0x3f] }
  0x37   :  { %v531_v2 = vld [vmem:[#allocation2] sm:$0x3f] }
  0xb4   :  { %v829_v19 = vpop.xlane.xlu0 %311 }
  0xb5   :  { %vm313_vm4 = vcmp.eq.f32.partialorder %v591_v3, %v829_v19  ;;  %vm314_vm5 = vcmp.eq.f32.partialorder %v593_v4, %v829_v19  ;;  %vm315_vm6 = vcmp.eq.f32.partialorder %v595_v5, %v829_v19  ;;  %vm316_vm7 = vcmp.eq.f32.partialorder %v597_v6, %v829_v19 }
  0xb6   :  { %vm317_vm8 = vcmp.eq.f32.partialorder %v599_v7, %v829_v19  ;;  %vm318_vm9 = vcmp.eq.f32.partialorder %v601_v8, %v829_v19  ;;  %vm319_vm10 = vcmp.eq.f32.partialorder %v603_v9, %v829_v19  ;;  %vm320_vm11 = vcmp.eq.f32.partialorder %v605_v10, %v829_v19 }
  0xb7   :  { %vm321_vm12 = vcmp.eq.f32.partialorder %v607_v11, %v829_v19  ;;  %vm337_vm15 = vcmp.eq.f32.partialorder %v673_v52, %v829_v19  ;;  %vm338_vm0 = vcmp.eq.f32.partialorder %v675_v53, %v829_v19  ;;  %vm339_vm2 = vcmp.eq.f32.partialorder %v677_v54, %v829_v19 }
  0xb8   :  { %vm340_vm1 = vcmp.eq.f32.partialorder %v681_v59, %v829_v19  ;;  %vm341_vm3 = vcmp.eq.f32.partialorder %v689_v0, %v829_v19  ;;  %vm343_vm14 = vcmp.eq.f32.partialorder %v695_v25, %v829_v19  ;;  %v353_v26 = vsel %vm313_vm4, %v585_v1, 2147483647  ;;  %v1313_v25 = vld [vmem:[#allocation25_spill] sm:$0xff] }
  0xb9   :  { %v354_v22 = vsel %vm314_vm5, %v755_v27, 2147483647  ;;  %v355_v21 = vsel %vm315_vm6, %v758_v31, 2147483647  ;;  %vm1255_vm13 = vcmp.gt.f32.partialorder %v829_v19, %v916_v24  ;;  %v356_v58 = vsel %vm316_vm7, %v761_v32, 2147483647 }
  0xba   :  { %v357_v1 = vsel %vm317_vm8, %v764_v36, 2147483647  ;;  %v358_v3 = vsel %vm318_vm9, %v767_v37, 2147483647  ;;  %v532_v4 = vsel %vm1255_vm13, %v829_v19, %v531_v2  ;;  %vm344_vm4 = vcmp.eq.f32.partialorder %v703_v33, %v829_v19  ;;  %v1294_v27 = vld [vmem:[#allocation13_spill] sm:$0xff]  ;;  %v1296_v31 = vld [vmem:[#allocation14_spill] sm:$0xff] }
  0xbb   :  { %v359_v5 = vsel %vm319_vm10, %v770_v38, 2147483647  ;;  %v360_v6 = vsel %vm320_vm11, %v773_v39, 2147483647  ;;  %v361_v7 = vsel %vm321_vm12, %v776_v44, 2147483647  ;;  %vm345_vm6 = vcmp.eq.f32.partialorder %v705_v34, %v829_v19 }
  0xbc   :  { %vm1279_vm5 = vcmask 5120   ;;  %vm1280_vm7 = vcmp.eq.f32.partialorder %v609_v12, %v829_v19  ;;  %vm1281_vm8 = vcmp.eq.f32.partialorder %v611_v13, %v829_v19  ;;  %vm1282_vm9 = vcmp.eq.f32.partialorder %v613_v14, %v829_v19  ;;  %v1298_v32 = vld [vmem:[#allocation15_spill] sm:$0xff]  ;;  %v1300_v36 = vld [vmem:[#allocation10_spill] sm:$0xff]  ;;  %v1301_v37 = vld [vmem:[#allocation16_spill] sm:$0xff] }
  0xbd   :  { %533 = vst.msk [vmem:[#allocation2] sm:$0x3f] %vm1279_vm5, %v532_v4  ;;  %v362_v2 = vsel %vm1280_vm7, %v779_v45, 2147483647  ;;  %v363_v8 = vsel %vm1281_vm8, %v782_v46, 2147483647  ;;  %vm346_vm10 = vcmp.eq.f32.partialorder %v709_v43, %v829_v19  ;;  %vm1283_vm11 = vcmp.eq.f32.partialorder %v615_v15, %v829_v19 }
  0xbe   :  { %v364_v9 = vsel %vm1282_vm9, %v785_v48, 2147483647  ;;  %v999_v10 = vsel %vm1283_vm11, %v788_v51, 2147483647  ;;  %vm1284_vm12 = vcmp.eq.f32.partialorder %v617_v16, %v829_v19  ;;  %vm1285_vm5 = vcmp.eq.f32.partialorder %v619_v17, %v829_v19  ;;  %v1302_v38 = vld [vmem:[#allocation17_spill] sm:$0xff]  ;;  %v1303_v39 = vld [vmem:[#allocation18_spill] sm:$0xff] }
  0xbf   :  { %v1005_v11 = vsel %vm1284_vm12, %v791_v55, 2147483647  ;;  %v1011_v12 = vsel %vm1285_vm5, %v794_v56, 2147483647  ;;  %vm347_vm7 = vcmp.eq.f32.partialorder %v717_v49, %v829_v19  ;;  %vm1286_vm8 = vcmp.eq.f32.partialorder %v629_v23, %v829_v19  ;;  %v1291_v23 = vld [vmem:[#allocation12_spill] sm:$0xff]  ;;  %v1304_v44 = vld [vmem:[#allocation11_spill] sm:$0xff] }
  0xc0   :  { %v368_v13 = vsel %vm1286_vm8, %v797_v57, 2147483647  ;;  %vm1287_vm9 = vcmp.eq.f32.partialorder %v641_v28, %v829_v19  ;;  %vm1288_vm11 = vcmp.eq.f32.partialorder %v643_v29, %v829_v19  ;;  %vm348_vm12 = vcmp.eq.f32.partialorder %v719_v50, %v829_v19  ;;  %v1293_v29 = vld [vmem:[#allocation9_spill] sm:$0xff]  ;;  %v1305_v45 = vld [vmem:[#allocation19_spill] sm:$0xff]  ;;  %v1306_v46 = vld [vmem:[#allocation20_spill] sm:$0xff] }
  0xc1   :  { %v1023_v14 = vsel %vm1287_vm9, %v800_v60, 2147483647  ;;  %v1029_v15 = vsel %vm1288_vm11, %v803_v61, 2147483647  ;;  %vm1289_vm5 = vcmp.eq.f32.partialorder %v645_v30, %v829_v19  ;;  %vm1290_vm8 = vcmp.eq.f32.partialorder %v649_v35, %v829_v19  ;;  %v1307_v48 = vld [vmem:[#allocation21_spill] sm:$0xff]  ;;  %v1309_v51 = vld [vmem:[#allocation8_spill] sm:$0xff] }
  0xc2   :  { %v1037_v16 = vsel %vm1289_vm5, %v806_v62, 2147483647  ;;  %v1043_v17 = vsel %vm1290_vm8, %v809_v63, 2147483647  ;;  %vm1292_vm9 = vcmp.eq.f32.partialorder %v657_v40, %v829_v19  ;;  %vm349_vm11 = vcmp.eq.f32.partialorder %v1293_v29, %v829_v19  ;;  %v1310_v55 = vld [vmem:[#allocation22_spill] sm:$0xff]  ;;  %v1311_v56 = vld [vmem:[#allocation23_spill] sm:$0xff] }
  0xc3   :  { %v1049_v28 = vsel %vm1292_vm9, %v1291_v23, 2147483647  ;;  %vm1295_vm5 = vcmp.eq.f32.partialorder %v659_v41, %v829_v19  ;;  %vm1297_vm8 = vcmp.eq.f32.partialorder %v661_v42, %v829_v19  ;;  %vm1299_vm9 = vcmp.eq.f32.partialorder %v665_v47, %v829_v19  ;;  %v1312_v57 = vld [vmem:[#allocation24_spill] sm:$0xff]  ;;  %v1314_v33 = vld [vmem:[#allocation26_spill] sm:$0xff]  ;;  %v1315_v34 = vld [vmem:[#allocation27_spill] sm:$0xff] }
  0xc4   :  { %v1057_v30 = vsel %vm1295_vm5, %v1294_v27, 2147483647  ;;  %v1063_v35 = vsel %vm1297_vm8, %v1296_v31, 2147483647  ;;  %v1069_v40 = vsel %vm1299_vm9, %v1298_v32, 2147483647  ;;  %vm350_vm13 = vcmp.eq.f32.partialorder %v1300_v36, %v829_v19 }
  0xc5   :  { %v1077_v41 = vsel %vm337_vm15, %v1301_v37, 2147483647  ;;  %v1083_v42 = vsel %vm338_vm0, %v1302_v38, 2147483647  ;;  %v1089_v47 = vsel %vm339_vm2, %v1303_v39, 2147483647  ;;  %vm351_vm5 = vcmp.eq.f32.partialorder %v1304_v44, %v829_v19 }
  0xc6   :  { %v1097_v52 = vsel %vm340_vm1, %v1305_v45, 2147483647  ;;  %v1103_v53 = vsel %vm341_vm3, %v1306_v46, 2147483647  ;;  %vm1308_vm2 = vcmp.eq.f32.partialorder %v691_v18, %v829_v19  ;;  %vm352_vm15 = vcmp.eq.f32.partialorder %v1309_v51, %v829_v19  ;;  %v1316_v43 = vld [vmem:[#allocation28_spill] sm:$0xff]  ;;  %v1317_v49 = vld [vmem:[#allocation29_spill] sm:$0xff] }
  0xc7   :  { %v1109_v54 = vsel %vm1308_vm2, %v1307_v48, 2147483647  ;;  %v1117_v59 = vsel %vm343_vm14, %v1310_v55, 2147483647  ;;  %v1123_v0 = vsel %vm344_vm4, %v1311_v56, 2147483647 }
  0xc8   :  { %v1129_v18 = vsel %vm345_vm6, %v850_v20, 2147483647  ;;  %v1135_v60 = vsel %vm346_vm10, %v1312_v57, 2147483647  ;;  %v1141_v61 = vsel %vm347_vm7, %v1313_v25, 2147483647 }
  0xc9   :  { %v1147_v62 = vsel %vm348_vm12, %v1314_v33, 2147483647  ;;  %v1153_v20 = vsel %vm349_vm11, %v1315_v34, 2147483647  ;;  %v1159_v63 = vsel %vm350_vm13, %v1316_v43, 2147483647 }
  0xca   :  { %v1162_v4 = vsel %vm351_vm5, %v1317_v49, 2147483647  ;;  %v1318_v23 = vld [vmem:[#allocation7_spill] sm:$0xff]  ;;  %vm1319_vm1 = vcmask 1045504  }
  0xcb   :  { %v1165_v27 = vsel %vm352_vm15, %v1318_v23, 2147483647  ;;  %v393_v50 = vsel %vm1319_vm1, %v353_v26, 2147483647  ;;  %vm1320_vm3 = vmmov %vm1319_vm1 }
  0xcc   :  { %v394_v31 = vsel %vm1320_vm3, %v354_v22, 2147483647  ;;  %vm1321_vm14 = vmmov %vm1319_vm1 }
  0xcd   :  { %v395_v29 = vsel %vm1321_vm14, %v355_v21, 2147483647  ;;  %vm1322_vm0 = vmmov %vm1319_vm1 }
  0xce   :  { %v396_v32 = vsel %vm1322_vm0, %v356_v58, 2147483647  ;;  %vm1323_vm4 = vmmov %vm1322_vm0 }
  0xcf   :  { %v397_v37 = vsel %vm1323_vm4, %v357_v1, 2147483647  ;;  %vm1324_vm10 = vmmov %vm1322_vm0 }
  0xd0   :  { %vm398_vm6 = vcmp.lt.s32.totalorder %v393_v50, %v397_v37  ;;  %v400_v36 = vsel %vm1324_vm10, %v358_v3, 2147483647  ;;  %vm1325_vm13 = vmmov %vm1322_vm0 }
  0xd1   :  { %v403_v38 = vsel %vm1325_vm13, %v359_v5, 2147483647  ;;  %vm1326_vm7 = vmmov %vm1322_vm0  ;;  %v399_v44 = vsel %vm398_vm6, %v393_v50, %v397_v37  ;;  %vm401_vm12 = vcmp.lt.s32.totalorder %v394_v31, %v400_v36 }
  0xd2   :  { %v406_v39 = vsel %vm1326_vm7, %v360_v6, 2147483647  ;;  %vm404_vm11 = vcmp.lt.s32.totalorder %v395_v29, %v403_v38  ;;  %v402_v26 = vsel %vm401_vm12, %v394_v31, %v400_v36  ;;  %vm1327_vm9 = vmmov %vm1322_vm0 }
  0xd3   :  { %vm407_vm8 = vcmp.lt.s32.totalorder %v396_v32, %v406_v39  ;;  %v405_v45 = vsel %vm404_vm11, %v395_v29, %v403_v38  ;;  %v409_v21 = vsel %vm1327_vm9, %v361_v7, 2147483647  ;;  %vm1328_vm2 = vmmov %vm1322_vm0 }
  0xd4   :  { %v408_v22 = vsel %vm407_vm8, %v396_v32, %v406_v39  ;;  %vm410_vm5 = vcmp.lt.s32.totalorder %v399_v44, %v409_v21  ;;  %v412_v58 = vsel %vm1328_vm2, %v362_v2, 2147483647  ;;  %vm1329_vm15 = vmmov %vm1322_vm0 }
  0xd5   :  { %v415_v1 = vsel %vm1329_vm15, %v363_v8, 2147483647  ;;  %vm1330_vm1 = vmmov %vm1322_vm0  ;;  %v411_v46 = vsel %vm410_vm5, %v399_v44, %v409_v21  ;;  %vm413_vm3 = vcmp.lt.s32.totalorder %v402_v26, %v412_v58 }
  0xd6   :  { %v418_v3 = vsel %vm1330_vm1, %v364_v9, 2147483647  ;;  %vm416_vm14 = vcmp.lt.s32.totalorder %v405_v45, %v415_v1  ;;  %v414_v5 = vsel %vm413_vm3, %v402_v26, %v412_v58  ;;  %vm1331_vm4 = vmmov %vm1330_vm1 }
  0xd7   :  { %vm419_vm0 = vcmp.lt.s32.totalorder %v408_v22, %v418_v3  ;;  %v417_v6 = vsel %vm416_vm14, %v405_v45, %v415_v1  ;;  %v421_v51 = vsel %vm1331_vm4, %v999_v10, 2147483647  ;;  %vm1332_vm10 = vmmov %vm1330_vm1 }
  0xd8   :  { %v420_v48 = vsel %vm419_vm0, %v408_v22, %v418_v3  ;;  %vm422_vm6 = vcmp.lt.s32.totalorder %v411_v46, %v421_v51  ;;  %v424_v7 = vsel %vm1332_vm10, %v1005_v11, 2147483647  ;;  %vm1333_vm13 = vmmov %vm1330_vm1 }
  0xd9   :  { %v427_v2 = vsel %vm1333_vm13, %v1011_v12, 2147483647  ;;  %vm1334_vm7 = vmmov %vm1330_vm1  ;;  %v423_v9 = vsel %vm422_vm6, %v411_v46, %v421_v51  ;;  %vm425_vm12 = vcmp.lt.s32.totalorder %v414_v5, %v424_v7  ;;  %v442_v12 = vsel %vm1330_vm1, %v1043_v17, 2147483647 }
  0xda   :  { %v430_v8 = vsel %vm1334_vm7, %v368_v13, 2147483647  ;;  %vm428_vm11 = vcmp.lt.s32.totalorder %v417_v6, %v427_v2  ;;  %v426_v55 = vsel %vm425_vm12, %v414_v5, %v424_v7  ;;  %vm1335_vm9 = vmmov %vm1330_vm1 }
  0xdb   :  { %vm431_vm8 = vcmp.lt.s32.totalorder %v420_v48, %v430_v8  ;;  %v429_v56 = vsel %vm428_vm11, %v417_v6, %v427_v2  ;;  %v433_v25 = vsel %vm1335_vm9, %v1023_v14, 2147483647  ;;  %vm1336_vm2 = vmmov %vm1330_vm1 }
  0xdc   :  { %v432_v57 = vsel %vm431_vm8, %v420_v48, %v430_v8  ;;  %vm434_vm5 = vcmp.lt.s32.totalorder %v423_v9, %v433_v25  ;;  %v436_v10 = vsel %vm1336_vm2, %v1029_v15, 2147483647  ;;  %vm1337_vm15 = vmmov %vm1330_vm1 }
  0xdd   :  { %v439_v11 = vsel %vm1337_vm15, %v1037_v16, 2147483647  ;;  %v435_v13 = vsel %vm434_vm5, %v423_v9, %v433_v25  ;;  %vm437_vm3 = vcmp.lt.s32.totalorder %v426_v55, %v436_v10  ;;  %vm443_vm0 = vcmp.lt.s32.totalorder %v432_v57, %v442_v12  ;;  %vm1338_vm4 = vmmov %vm1330_vm1 }
  0xde   :  { %vm440_vm14 = vcmp.lt.s32.totalorder %v429_v56, %v439_v11  ;;  %v438_v33 = vsel %vm437_vm3, %v426_v55, %v436_v10  ;;  %v444_v43 = vsel %vm443_vm0, %v432_v57, %v442_v12  ;;  %v445_v14 = vsel %vm1338_vm4, %v1049_v28, 2147483647  ;;  %vm1339_vm10 = vmmov %vm1330_vm1 }
  0xdf   :  { %v441_v34 = vsel %vm440_vm14, %v429_v56, %v439_v11  ;;  %vm446_vm6 = vcmp.lt.s32.totalorder %v435_v13, %v445_v14  ;;  %v448_v15 = vsel %vm1339_vm10, %v1057_v30, 2147483647  ;;  %vm1340_vm13 = vmmov %vm1330_vm1 }
  0xe0   :  { %v451_v16 = vsel %vm1340_vm13, %v1063_v35, 2147483647  ;;  %vm1341_vm7 = vmmov %vm1330_vm1  ;;  %v447_v49 = vsel %vm446_vm6, %v435_v13, %v445_v14  ;;  %vm449_vm12 = vcmp.lt.s32.totalorder %v438_v33, %v448_v15 }
  0xe1   :  { %v454_v17 = vsel %vm1341_vm7, %v1069_v40, 2147483647  ;;  %vm452_vm11 = vcmp.lt.s32.totalorder %v441_v34, %v451_v16  ;;  %v450_v23 = vsel %vm449_vm12, %v438_v33, %v448_v15  ;;  %vm1342_vm9 = vmmov %vm1330_vm1  ;;  %v466_v40 = vsel %vm1330_vm1, %v1097_v52, 2147483647 }
  0xe2   :  { %vm455_vm8 = vcmp.lt.s32.totalorder %v444_v43, %v454_v17  ;;  %v453_v50 = vsel %vm452_vm11, %v441_v34, %v451_v16  ;;  %v457_v28 = vsel %vm1342_vm9, %v1077_v41, 2147483647  ;;  %vm1343_vm2 = vmmov %vm1330_vm1 }
  0xe3   :  { %v456_v31 = vsel %vm455_vm8, %v444_v43, %v454_v17  ;;  %vm458_vm5 = vcmp.lt.s32.totalorder %v447_v49, %v457_v28  ;;  %v460_v30 = vsel %vm1343_vm2, %v1083_v42, 2147483647  ;;  %vm1344_vm15 = vmmov %vm1330_vm1 }
  0xe4   :  { %v463_v35 = vsel %vm1344_vm15, %v1089_v47, 2147483647  ;;  %v459_v29 = vsel %vm458_vm5, %v447_v49, %v457_v28  ;;  %vm461_vm3 = vcmp.lt.s32.totalorder %v450_v23, %v460_v30  ;;  %vm467_vm0 = vcmp.lt.s32.totalorder %v456_v31, %v466_v40  ;;  %vm1345_vm4 = vmmov %vm1330_vm1 }
  0xe5   :  { %vm464_vm14 = vcmp.lt.s32.totalorder %v453_v50, %v463_v35  ;;  %v462_v32 = vsel %vm461_vm3, %v450_v23, %v460_v30  ;;  %v468_v36 = vsel %vm467_vm0, %v456_v31, %v466_v40  ;;  %v469_v41 = vsel %vm1345_vm4, %v1103_v53, 2147483647  ;;  %vm1346_vm10 = vmmov %vm1330_vm1 }
  0xe6   :  { %v465_v37 = vsel %vm464_vm14, %v453_v50, %v463_v35  ;;  %vm470_vm6 = vcmp.lt.s32.totalorder %v459_v29, %v469_v41  ;;  %v472_v42 = vsel %vm1346_vm10, %v1109_v54, 2147483647  ;;  %vm1347_vm13 = vmmov %vm1330_vm1 }
  0xe7   :  { %v475_v47 = vsel %vm1347_vm13, %v1117_v59, 2147483647  ;;  %vm1348_vm7 = vmmov %vm1330_vm1  ;;  %v471_v38 = vsel %vm470_vm6, %v459_v29, %v469_v41  ;;  %vm473_vm12 = vcmp.lt.s32.totalorder %v462_v32, %v472_v42 }
  0xe8   :  { %v478_v52 = vsel %vm1348_vm7, %v1123_v0, 2147483647  ;;  %vm476_vm11 = vcmp.lt.s32.totalorder %v465_v37, %v475_v47  ;;  %v474_v39 = vsel %vm473_vm12, %v462_v32, %v472_v42  ;;  %vm1349_vm9 = vmmov %vm1330_vm1  ;;  %v490_v0 = vsel %vm1330_vm1, %v1147_v62, 2147483647 }
  0xe9   :  { %vm479_vm8 = vcmp.lt.s32.totalorder %v468_v36, %v478_v52  ;;  %v477_v44 = vsel %vm476_vm11, %v465_v37, %v475_v47  ;;  %v481_v53 = vsel %vm1349_vm9, %v1129_v18, 2147483647  ;;  %vm1350_vm2 = vmmov %vm1330_vm1  ;;  %vm1355_vm7 = vcmask 62464  }
  0xea   :  { %v480_v26 = vsel %vm479_vm8, %v468_v36, %v478_v52  ;;  %vm482_vm5 = vcmp.lt.s32.totalorder %v471_v38, %v481_v53  ;;  %v484_v54 = vsel %vm1350_vm2, %v1135_v60, 2147483647  ;;  %vm1351_vm15 = vmmov %vm1330_vm1  ;;  %v502_v62 = vsel %vm1355_vm7, %v1165_v27, 2147483647 }
  0xeb   :  { %v487_v59 = vsel %vm1351_vm15, %v1141_v61, 2147483647  ;;  %v483_v45 = vsel %vm482_vm5, %v471_v38, %v481_v53  ;;  %vm485_vm3 = vcmp.lt.s32.totalorder %v474_v39, %v484_v54  ;;  %vm491_vm0 = vcmp.lt.s32.totalorder %v480_v26, %v490_v0  ;;  %vm1352_vm4 = vmmov %vm1330_vm1 }
  0xec   :  { %vm488_vm14 = vcmp.lt.s32.totalorder %v477_v44, %v487_v59  ;;  %v486_v22 = vsel %vm485_vm3, %v474_v39, %v484_v54  ;;  %v492_v58 = vsel %vm491_vm0, %v480_v26, %v490_v0  ;;  %v493_v18 = vsel %vm1352_vm4, %v1153_v20, 2147483647  ;;  %vm1353_vm10 = vmmov %vm1330_vm1 }
  0xed   :  { %v489_v21 = vsel %vm488_vm14, %v477_v44, %v487_v59  ;;  %vm494_vm6 = vcmp.lt.s32.totalorder %v483_v45, %v493_v18  ;;  %v496_v60 = vsel %vm1353_vm10, %v1159_v63, 2147483647  ;;  %vm1354_vm13 = vmmov %vm1330_vm1  ;;  %vm503_vm8 = vcmp.lt.s32.totalorder %v492_v58, %v502_v62 }
  0xee   :  { %v499_v61 = vsel %vm1354_vm13, %v1162_v4, 2147483647  ;;  %v495_v1 = vsel %vm494_vm6, %v483_v45, %v493_v18  ;;  %vm497_vm12 = vcmp.lt.s32.totalorder %v486_v22, %v496_v60  ;;  %v504_v5 = vsel %vm503_vm8, %v492_v58, %v502_v62 }
  0xef   :  { %vm500_vm11 = vcmp.lt.s32.totalorder %v489_v21, %v499_v61  ;;  %v498_v3 = vsel %vm497_vm12, %v486_v22, %v496_v60  ;;  %v571_v4 = vmov 0   ;;  %vm1356_vm15 = vcmask 5120  }
  0xf0   :  { %v501_v46 = vsel %vm500_vm11, %v489_v21, %v499_v61  ;;  %vm505_vm9 = vcmp.lt.s32.totalorder %v495_v1, %v498_v3  ;;  %26 = vst.msk [vmem:[#allocation3] sm:$0x3f] %vm1356_vm15, %v571_v4  ;;  %vm1357_vm3 = vcmp.gt.f32.partialorder %v829_v19, %v916_v24  ;;  %vm1358_vm14 = vmmov %vm1356_vm15 }
  0xf1   :  { %vm507_vm5 = vcmp.lt.s32.totalorder %v501_v46, %v504_v5  ;;  %v506_v20 = vsel %vm505_vm9, %v495_v1, %v498_v3  ;;  %vm1359_vm0 = vmmov %vm1358_vm14 }
  0xf2   :  { %v508_v6 = vsel %vm507_vm5, %v501_v46, %v504_v5 }
  0xf3   :  { %vm509_vm2 = vcmp.lt.s32.totalorder %v506_v20, %v508_v6 }
  0xf4   :  { %v510_v48 = vsel %vm509_vm2, %v506_v20, %v508_v6 }
  0xf5   :  { %v512_v63 = vshra.s32 %v510_v48, 16  ;;  %v511_v27 = vand.u32 65535, %v510_v48 }
  0xf7   :  { %v514_v51 = vcvt.s32.f32 %v512_v63  ;;  %v513_v2 = vcvt.s32.f32 %v511_v27  ;;  %v527_v25 = vld [vmem:[#allocation3] sm:$0x3f] }
  0xf9   :  { %515 = vmin.xlane.f32.xlu0 %v514_v51 }
 0x182   :  { %v516_v7 = vpop.xlane.xlu0 %515 }
 0x183   :  { %vm517_vm1 = vcmp.eq.f32.partialorder %v514_v51, %v516_v7  ;;  %v522_v9 = vcvt.f32.s32 %v516_v7 }
 0x184   :  { %v518_v8 = vsel %vm517_vm1, %v513_v2, inf }
 0x185   :  { %519 = vmin.xlane.f32.xlu1 %v518_v8  ;;  %v523_v56 = vshll.u32 %v522_v9, 16 }
 0x20e   :  { %v520_v55 = vpop.xlane.xlu1 %519 }
 0x20f   :  { %v521_v57 = vcvt.f32.s32 %v520_v55 }
 0x211   :  { %v524_v10 = vadd.s32 %v523_v56, %v521_v57 }
 0x213   :  { %v528_v11 = vsel %vm1357_vm3, %v524_v10, %v527_v25 }
 0x214   :  { %530 = vst.msk [vmem:[#allocation3] sm:$0x3f] %vm1358_vm14, %v528_v11 }
 0x21b   :  { %v537_v12 = vld [vmem:[#allocation3] sm:$0x3f] }
 0x21c   :  { %538 = vst.msk [vmem:[%s1244_s1] sm:$0x3f] %vm1359_vm0, %v537_v12 }
 0x21d   :  { %543 = vsyncpa [#allocation5], 1 }

</bundles_post_ra>
